<compile_context>
chip_gen: v6e
topology: v6e:2x2x1
jax: 0.10.0
libtpu: 0.0.40
codegen_flags: <defaults>
</compile_context>

<pallas_src>
import functools

import jax
import jax.numpy as jnp
from jax.experimental import pallas as pl
from jax.experimental.pallas import tpu as pltpu


# ---------------------------------------------------------------------------
# Kernel
# ---------------------------------------------------------------------------
def _attention_kernel(w_ref, x_ref, o_ref, m_sc, l_sc, acc_sc, *, seq_len):
    # w_ref:   (1, H)           attention projection weight (lane-dense, x dtype)
    # x_ref:   (TB, S_TILE, H)  TB batch rows, one sequence tile
    # o_ref:   (TB, H)          context output (resident across the seq axis)
    # m_sc:    (TB, 1)  f32     online-softmax running max
    # l_sc:    (TB, 1)  f32     online-softmax running denominator
    # acc_sc:  (TB, 1, H) f32   unnormalized context accumulator
    # seq_len: int | None       true sequence length (None if no seq padding)
    s_idx = pl.program_id(1)

    @pl.when(s_idx == 0)
    def _init():
        m_sc[...] = jnp.full(m_sc.shape, -jnp.inf, dtype=m_sc.dtype)
        l_sc[...] = jnp.zeros(l_sc.shape, dtype=l_sc.dtype)
        acc_sc[...] = jnp.zeros(acc_sc.shape, dtype=acc_sc.dtype)

    x = x_ref[...]                      # (TB, S_TILE, H), input dtype (no full upcast)
    w = w_ref[...]                      # (1, H), already cast to x dtype in wrapper
    s_tile = x.shape[1]

    # Attention scores on VPU (mul) + XLU (lane reduce); keeps the MXU free
    # for the weighted-sum contraction below.
    scores = jnp.sum(x * w, axis=-1).astype(jnp.float32)        # (TB, S_TILE)

    if seq_len is not None:
        # Mask padded sequence positions to -inf before the running max / exp.
        pos = s_idx * s_tile + jax.lax.broadcasted_iota(jnp.int32, scores.shape, 1)
        scores = jnp.where(pos < seq_len, scores, -jnp.inf)

    # Online (streaming) softmax over the sequence axis.
    m_prev = m_sc[...]                                           # (TB, 1)
    m_new = jnp.maximum(m_prev, jnp.max(scores, axis=-1, keepdims=True))
    alpha = jnp.exp(m_prev - m_new)                              # (TB, 1)
    p = jnp.exp(scores - m_new)                                  # (TB, S_TILE)

    l_sc[...] = alpha * l_sc[...] + jnp.sum(p, axis=-1, keepdims=True)
    # Weighted sum over the sequence tile on the MXU (transpose-free operand
    # orientation); normalization deferred to the finalize step.
    acc_sc[...] = alpha[:, :, None] * acc_sc[...] + jnp.einsum(
        "bqs,bsh->bqh", p[:, None, :].astype(x.dtype), x,
        preferred_element_type=jnp.float32)
    m_sc[...] = m_new

    @pl.when(s_idx == pl.num_programs(1) - 1)
    def _finalize():
        inv_l = pl.reciprocal(l_sc[...], approx=False)           # (TB, 1), cheap EUP
        o_ref[...] = (acc_sc[:, 0, :] * inv_l).astype(o_ref.dtype)


# ---------------------------------------------------------------------------
# Tiling helpers
# ---------------------------------------------------------------------------
def _round_up(x, m):
    return (x + m - 1) // m * m


def _vmem_plan():
    """Generation-aware VMEM budget.

    Returns (vmem_limit_bytes, per_x_block_bytes) such that two double-buffered
    x blocks plus f32 scratch / output / weight fit under the limit with
    headroom for Mosaic internal scratch.
    """
    try:
        cap = int(pltpu.get_tpu_info().vmem_capacity_bytes)
    except Exception:
        cap = 64 * 1024 * 1024          # conservative (v7x-sized) fallback
    headroom = 16 * 1024 * 1024         # Mosaic internals / pipeline slack
    limit = max(32 * 1024 * 1024, min(cap - headroom, 112 * 1024 * 1024))
    reserve = 4 * 1024 * 1024           # scratch + output + weight blocks
    per_block = min(24 * 1024 * 1024, (limit - reserve) // 2)   # 2x buffered x
    return int(limit), int(per_block)


def _pick_batch_tile(batch, pack, max_tb=128):
    """Batch tile: multiple of the sublane pack (8 f32 / 16 bf16), as large as
    possible up to max_tb, but keeping >= 2 blocks on the parallel batch axis
    when batch allows (v7x megacore)."""
    tb = min(_round_up(batch, pack), _round_up(max_tb, pack))
    while tb > pack and _round_up(batch, tb) // tb < 2:
        tb = max(pack, _round_up(tb // 2, pack))
    return tb


def _pick_seq_tile(seq, tb, hidden, itemsize, block_bytes):
    """Seq tile chosen purely by the VMEM block budget (multiple of 8); the
    sequence is padded up to a multiple of it, never the other way around."""
    rows = max(8, block_bytes // max(1, tb * hidden * itemsize))
    s_tile = max(8, (rows // 8) * 8)
    return min(s_tile, _round_up(seq, 8))


# ---------------------------------------------------------------------------
# Wrapper
# ---------------------------------------------------------------------------
def attention_forward(x, w, *, tb=None, s_tile=None):
    """x: (B, S, H); w: (1, H) PyTorch-style Linear(hidden, 1) weight.
    Returns the (B, H) attention context."""
    B, S, H = x.shape
    w2 = jnp.asarray(w).reshape(1, H).astype(x.dtype)   # lane-dense weight layout

    itemsize = jnp.dtype(x.dtype).itemsize
    pack = max(8, 32 // itemsize)                        # 8 for f32, 16 for bf16
    vmem_limit, block_bytes = _vmem_plan()

    if tb is None:
        tb = _pick_batch_tile(B, pack)
    if s_tile is None:
        s_tile = _pick_seq_tile(S, tb, H, itemsize, block_bytes)

    # Pad (instead of falling back to whole-array blocks) so tiles always
    # respect the VMEM budget; padded seq positions are masked in-kernel.
    b_pad = _round_up(B, tb)
    s_pad = _round_up(S, s_tile)
    x_in = x
    if (b_pad, s_pad) != (B, S):
        x_in = jnp.pad(x, ((0, b_pad - B), (0, s_pad - S), (0, 0)))
    seq_len = S if s_pad != S else None

    grid = (b_pad // tb, s_pad // s_tile)   # batch parallel (megacore), seq last

    kernel = functools.partial(_attention_kernel, seq_len=seq_len)

    out = pl.pallas_call(
        kernel,
        out_shape=jax.ShapeDtypeStruct((b_pad, H), x.dtype),
        grid_spec=pltpu.PrefetchScalarGridSpec(
            num_scalar_prefetch=0,
            grid=grid,
            in_specs=[
                pl.BlockSpec((1, H), lambda b, s: (0, 0)),              # weight
                pl.BlockSpec((tb, s_tile, H), lambda b, s: (b, s, 0)),  # x tile
            ],
            out_specs=pl.BlockSpec((tb, H), lambda b, s: (b, 0)),       # seq-resident
            scratch_shapes=[
                pltpu.VMEM((tb, 1), jnp.float32),     # running max
                pltpu.VMEM((tb, 1), jnp.float32),     # running denominator
                pltpu.VMEM((tb, 1, H), jnp.float32),  # unnormalized context acc
            ],
        ),
        compiler_params=pltpu.CompilerParams(
            dimension_semantics=("parallel", "arbitrary"),
            vmem_limit_bytes=vmem_limit,
        ),
    )(w2, x_in)

    return out[:B] if b_pad != B else out


def attention_reference(x, w):
    """Pure-JAX reference mirroring the PyTorch forward."""
    xf = x.astype(jnp.float32)
    scores = jnp.einsum("bsh,oh->bso", xf, w.astype(jnp.float32))   # (B, S, 1)
    weights = jax.nn.softmax(scores, axis=1)
    return jnp.sum(xf * weights, axis=1).astype(x.dtype)            # (B, H)


if __name__ == "__main__":
    # Small shapes; S deliberately not a multiple of 8 to exercise the
    # sequence-padding / -inf masking path, B chosen so the parallel batch
    # axis gets >= 2 blocks.
    B, S, H = 16, 20, 128

    key = jax.random.PRNGKey(0)
    kx, kw = jax.random.split(key)
    x = jax.random.normal(kx, (B, S, H), dtype=jnp.float32)
    # Deterministic init of nn.Linear(hidden_size, 1, bias=False) weight: (1, H)
    bound = 1.0 / (H ** 0.5)
    w = jax.random.uniform(kw, (1, H), dtype=jnp.float32,
                           minval=-bound, maxval=bound)

    ref = attention_reference(x, w)

    # Default tiling (budget-chosen seq tile, padded + masked tail).
    out = jax.block_until_ready(attention_forward(x, w))
    assert out.shape == (B, H)
    assert jnp.allclose(out, ref, atol=1e-4, rtol=1e-4), "mismatch (default tiling)"

    # Force a multi-step seq grid to exercise the online-softmax accumulation
    # across several tiles plus the parallel batch axis.
    out2 = jax.block_until_ready(attention_forward(x, w, tb=8, s_tile=8))
    assert jnp.allclose(out2, ref, atol=1e-4, rtol=1e-4), "mismatch (tiled path)"

    print("KERNEL_OK")
</pallas_src>

<mosaic_0001>
module attributes {stable_mosaic.version = 11 : i64} {
  func.func @_attention_kernel(%arg0: i32, %arg1: i32, %arg2: memref<1x128xf32, #tpu.memory_space<vmem>>, %arg3: memref<8x24x128xf32, #tpu.memory_space<vmem>>, %arg4: memref<8x128xf32, #tpu.memory_space<vmem>>, %arg5: memref<8x1xf32, #tpu.memory_space<vmem>>, %arg6: memref<8x1xf32, #tpu.memory_space<vmem>>, %arg7: memref<8x1x128xf32, #tpu.memory_space<vmem>>) attributes {dimension_semantics = [#tpu.dimension_semantics<parallel>, #tpu.dimension_semantics<arbitrary>], iteration_bounds = array<i64: 2, 1>, scalar_prefetch = 0 : i64, scratch_operands = 3 : i64, tpu.core_type = #tpu.core_type<tc>, window_params = [{pipeline_mode = #tpu.pipeline_mode<synchronous>, transform_indices = @transform_0, window_bounds = array<i64: 1, 128>}, {transform_indices = @transform_1, window_bounds = array<i64: 8, 24, 128>}, {transform_indices = @transform_2, window_bounds = array<i64: 8, 128>}]} {
    %c0_i32 = arith.constant 0 : i32
    %0 = arith.cmpi eq, %arg1, %c0_i32 : i32
    %1 = arith.extui %0 : i1 to i32
    %c0_i32_0 = arith.constant 0 : i32
    %2 = arith.cmpi ne, %1, %c0_i32_0 : i32
    scf.if %2 {
      %cst_25 = arith.constant 0xFF800000 : f32
      %44 = vector.broadcast %cst_25 : f32 to vector<8x1xf32>
      %c0_26 = arith.constant 0 : index
      %c0_27 = arith.constant 0 : index
      %45 = vector.load %arg5[%c0_26, %c0_27] : memref<8x1xf32, #tpu.memory_space<vmem>>, vector<8x1xf32>
      tpu.vector_store %arg5[%c0_26, %c0_27], %44 {strides = array<i32>} : memref<8x1xf32, #tpu.memory_space<vmem>>, vector<8x1xf32>,
      %cst_28 = arith.constant 0.000000e+00 : f32
      %46 = vector.broadcast %cst_28 : f32 to vector<8x1xf32>
      %c0_29 = arith.constant 0 : index
      %c0_30 = arith.constant 0 : index
      %47 = vector.load %arg6[%c0_29, %c0_30] : memref<8x1xf32, #tpu.memory_space<vmem>>, vector<8x1xf32>
      tpu.vector_store %arg6[%c0_29, %c0_30], %46 {strides = array<i32>} : memref<8x1xf32, #tpu.memory_space<vmem>>, vector<8x1xf32>,
      %cst_31 = arith.constant 0.000000e+00 : f32
      %48 = vector.broadcast %cst_31 : f32 to vector<8x1x128xf32>
      %c0_32 = arith.constant 0 : index
      %c0_33 = arith.constant 0 : index
      %c0_34 = arith.constant 0 : index
      %49 = vector.load %arg7[%c0_32, %c0_33, %c0_34] : memref<8x1x128xf32, #tpu.memory_space<vmem>>, vector<8x1x128xf32>
      tpu.vector_store %arg7[%c0_32, %c0_33, %c0_34], %48 {strides = array<i32>} : memref<8x1x128xf32, #tpu.memory_space<vmem>>, vector<8x1x128xf32>,
    } else {
    }
    %c0 = arith.constant 0 : index
    %c0_1 = arith.constant 0 : index
    %c0_2 = arith.constant 0 : index
    %3 = vector.load %arg3[%c0, %c0_1, %c0_2] : memref<8x24x128xf32, #tpu.memory_space<vmem>>, vector<8x24x128xf32>
    %c0_3 = arith.constant 0 : index
    %c0_4 = arith.constant 0 : index
    %4 = vector.load %arg2[%c0_3, %c0_4] : memref<1x128xf32, #tpu.memory_space<vmem>>, vector<1x128xf32>
    %5 = vector.shape_cast %4 : vector<1x128xf32> to vector<1x1x128xf32>
    %6 = vector.broadcast %5 : vector<1x1x128xf32> to vector<8x24x128xf32>
    %7 = arith.mulf %3, %6 : vector<8x24x128xf32>
    %cst = arith.constant dense<0.000000e+00> : vector<8x24xf32>
    %8 = vector.multi_reduction <add>, %7, %cst [2] : vector<8x24x128xf32> to vector<8x24xf32>
    %c24_i32 = arith.constant 24 : i32
    %9 = arith.muli %arg1, %c24_i32 : i32
    %10 = tpu.iota {dimensions = array<i32: 1>} : vector<8x24xi32>
    %11 = vector.broadcast %9 : i32 to vector<8x24xi32>
    %12 = arith.addi %11, %10 : vector<8x24xi32>
    %c20_i32 = arith.constant 20 : i32
    %13 = vector.broadcast %c20_i32 : i32 to vector<8x24xi32>
    %14 = arith.cmpi slt, %12, %13 : vector<8x24xi32>
    %cst_5 = arith.constant 0xFF800000 : f32
    %15 = vector.broadcast %cst_5 : f32 to vector<8x24xf32>
    %16 = arith.select %14, %8, %15 : vector<8x24xi1>, vector<8x24xf32>
    %c0_6 = arith.constant 0 : index
    %c0_7 = arith.constant 0 : index
    %17 = vector.load %arg5[%c0_6, %c0_7] : memref<8x1xf32, #tpu.memory_space<vmem>>, vector<8x1xf32>
    %cst_8 = arith.constant dense<0xFF800000> : vector<8xf32>
    %18 = vector.multi_reduction <maximumf>, %16, %cst_8 [1] : vector<8x24xf32> to vector<8xf32>
    %19 = vector.shape_cast %18 : vector<8xf32> to vector<8x1xf32>
    %20 = arith.maximumf %17, %19 : vector<8x1xf32>
    %21 = arith.subf %17, %20 : vector<8x1xf32>
    %22 = math.exp %21 : vector<8x1xf32>
    %23 = vector.broadcast %20 : vector<8x1xf32> to vector<8x24xf32>
    %24 = arith.subf %16, %23 : vector<8x24xf32>
    %25 = math.exp %24 : vector<8x24xf32>
    %c0_9 = arith.constant 0 : index
    %c0_10 = arith.constant 0 : index
    %26 = vector.load %arg6[%c0_9, %c0_10] : memref<8x1xf32, #tpu.memory_space<vmem>>, vector<8x1xf32>
    %27 = arith.mulf %22, %26 : vector<8x1xf32>
    %cst_11 = arith.constant dense<0.000000e+00> : vector<8xf32>
    %28 = vector.multi_reduction <add>, %25, %cst_11 [1] : vector<8x24xf32> to vector<8xf32>
    %29 = vector.shape_cast %28 : vector<8xf32> to vector<8x1xf32>
    %30 = arith.addf %27, %29 : vector<8x1xf32>
    %c0_12 = arith.constant 0 : index
    %c0_13 = arith.constant 0 : index
    %31 = vector.load %arg6[%c0_12, %c0_13] : memref<8x1xf32, #tpu.memory_space<vmem>>, vector<8x1xf32>
    tpu.vector_store %arg6[%c0_12, %c0_13], %30 {strides = array<i32>} : memref<8x1xf32, #tpu.memory_space<vmem>>, vector<8x1xf32>,
    %32 = vector.shape_cast %22 : vector<8x1xf32> to vector<8x1x1xf32>
    %c0_14 = arith.constant 0 : index
    %c0_15 = arith.constant 0 : index
    %c0_16 = arith.constant 0 : index
    %33 = vector.load %arg7[%c0_14, %c0_15, %c0_16] : memref<8x1x128xf32, #tpu.memory_space<vmem>>, vector<8x1x128xf32>
    %34 = vector.broadcast %32 : vector<8x1x1xf32> to vector<8x1x128xf32>
    %35 = arith.mulf %34, %33 : vector<8x1x128xf32>
    %36 = vector.shape_cast %25 : vector<8x24xf32> to vector<8x1x24xf32>
    "tpu.trace_start"() <{level = 10 : i32, message = "bqs,bsh->bqh"}> : () -> ()
    %cst_17 = arith.constant dense<0.000000e+00> : vector<8x1x128xf32>
    %37 = tpu.matmul %36, %3, %cst_17 {dimension_numbers = #tpu.dot_dimension_numbers<[2], [1], [1], [2], [0, 0, 0, 1, 1, 2], [0], [0]>} : vector<8x1x24xf32>, vector<8x24x128xf32>, vector<8x1x128xf32> -> vector<8x1x128xf32>
    "tpu.trace_stop"() : () -> ()
    %38 = arith.addf %35, %37 : vector<8x1x128xf32>
    %c0_18 = arith.constant 0 : index
    %c0_19 = arith.constant 0 : index
    %c0_20 = arith.constant 0 : index
    %39 = vector.load %arg7[%c0_18, %c0_19, %c0_20] : memref<8x1x128xf32, #tpu.memory_space<vmem>>, vector<8x1x128xf32>
    tpu.vector_store %arg7[%c0_18, %c0_19, %c0_20], %38 {strides = array<i32>} : memref<8x1x128xf32, #tpu.memory_space<vmem>>, vector<8x1x128xf32>,
    %c0_21 = arith.constant 0 : index
    %c0_22 = arith.constant 0 : index
    %40 = vector.load %arg5[%c0_21, %c0_22] : memref<8x1xf32, #tpu.memory_space<vmem>>, vector<8x1xf32>
    tpu.vector_store %arg5[%c0_21, %c0_22], %20 {strides = array<i32>} : memref<8x1xf32, #tpu.memory_space<vmem>>, vector<8x1xf32>,
    %c0_i32_23 = arith.constant 0 : i32
    %41 = arith.cmpi eq, %arg1, %c0_i32_23 : i32
    %42 = arith.extui %41 : i1 to i32
    %c0_i32_24 = arith.constant 0 : i32
    %43 = arith.cmpi ne, %42, %c0_i32_24 : i32
    scf.if %43 {
      %c0_25 = arith.constant 0 : index
      %c0_26 = arith.constant 0 : index
      %44 = vector.load %arg6[%c0_25, %c0_26] : memref<8x1xf32, #tpu.memory_space<vmem>>, vector<8x1xf32>
      %45 = tpu.reciprocal %44 : vector<8x1xf32> -> vector<8x1xf32>
      %c0_27 = arith.constant 0 : index
      %c0_28 = arith.constant 0 : index
      %c0_29 = arith.constant 0 : index
      %46 = vector.load %arg7[%c0_27, %c0_28, %c0_29] : memref<8x1x128xf32, #tpu.memory_space<vmem>>, vector<8x1x128xf32>
      %47 = vector.shape_cast %46 : vector<8x1x128xf32> to vector<8x128xf32>
      %48 = vector.broadcast %45 : vector<8x1xf32> to vector<8x128xf32>
      %49 = arith.mulf %47, %48 : vector<8x128xf32>
      %c0_30 = arith.constant 0 : index
      %c0_31 = arith.constant 0 : index
      %50 = vector.load %arg4[%c0_30, %c0_31] : memref<8x128xf32, #tpu.memory_space<vmem>>, vector<8x128xf32>
      tpu.vector_store %arg4[%c0_30, %c0_31], %49 {strides = array<i32>} : memref<8x128xf32, #tpu.memory_space<vmem>>, vector<8x128xf32>,
    } else {
    }
    return
  }
  func.func @transform_0(%arg0: i32, %arg1: i32) -> (i32, i32) {
    %c0_i32 = arith.constant 0 : i32
    %c0_i32_0 = arith.constant 0 : i32
    %c0_i32_1 = arith.constant 0 : i32
    return %c0_i32, %c0_i32_0 : i32, i32
  }
  func.func @transform_1(%arg0: i32, %arg1: i32) -> (i32, i32, i32) {
    %c0_i32 = arith.constant 0 : i32
    %c0_i32_0 = arith.constant 0 : i32
    return %arg0, %arg1, %c0_i32 : i32, i32, i32
  }
  func.func @transform_2(%arg0: i32, %arg1: i32) -> (i32, i32) {
    %c0_i32 = arith.constant 0 : i32
    %c0_i32_0 = arith.constant 0 : i32
    return %arg0, %c0_i32 : i32, i32
  }
}

</mosaic_0001>

<bundles_post_ra>
// kernel: tpu_custom_call.1
= control target key start
LH: loop header
LB: loop body
LE: loop exit
PB: predicated region body
PF: predicated region fallthrough
CT: control target
= control target key end

     0   :  { %7 = vsyncpa [#allocation6], 0  ;;  %s2382_s0 = inlined_call_operand.hbm [shape: f32[1,128], index: 0, kind: input, shape index: {}]   ;;  %s2383_s1 = inlined_call_operand.hbm [shape: f32[16,24,128], index: 1, kind: input, shape index: {}]   ;;  %s2384_s2 = inlined_call_operand.hbm [shape: f32[16,128], index: 2, kind: output, shape index: {}]  }
   0x1   :  { %8 = vsyncpa [#allocation9], 0 }
   0x2   :  { %10 = vsyncpa [#allocation9 + $0x1], 0 }
   0x3   :  { %11 = vsyncpa [#allocation7], 0 }
   0x4   :  { %13 = vsyncpa [#allocation7 + $0x1], 0  ;;  %s1887_s9 = smov 0   ;;  %s1889_s10 = smov 0  }
   0x5   :  { %s1891_s11 = smov 0   ;;  %s1893_s12 = smov 0  }
   0x6   :  { %s1895_s13 = smov 0   ;;  %s1897_s14 = smov 0  }
   0x7 LB: > { %s1503_s15 = sadd.s32 4294967295, %s1860_s14   ;;  %s1504_s16 = sadd.s32 4294967294, %s1860_s14   ;;  %s1860_s14 = sphi %s1897_s14, %s19_s14   ;;  %s1856_s13 = sphi %s1895_s13, %s2402_s13   ;;  %s1852_s12 = sphi %s1893_s12, %s2401_s12   ;;  %s1848_s11 = sphi %s1891_s11, %s2400_s11   ;;  %s1844_s10 = sphi %s1889_s10, %s2399_s10   ;;  %s1840_s9 = sphi %s1887_s9, %s2398_s9  }
   0x8   : > { %s61_s17 = sadd.s32 1, %s1848_s11  ;;  %p68_p0 = scmp.ne.s32.totalorder %s1848_s11, %s1844_s10 }
   0x9   : > { %p69_p1 = scmp.eq.s32.totalorder %s1860_s14, 0  ;;  %p74_p2 = scmp.ne.s32.totalorder %s1844_s10, %s1840_s9 }
   0xa   : > { %p1925_p3 = scmp.eq.s32.totalorder %s1503_s15, 0  ;;  %p98_p4 = scmp.eq.s32.totalorder %s1503_s15, 1 }
   0xb   : > { %p1929_p5 = por %p69_p1, %p68_p0  ;;  %p104_p6 = scmp.eq.s32.totalorder %s1504_s16, 1 }
   0xc   : > { %p1935_p7 = por %p1925_p3, %p74_p2  ;;  %p1939_p8 = por %p98_p4, %p68_p0 }
   0xd   : > { %p1943_p9 = por %p104_p6, %p74_p2  ;;  %p1505_p10 = scmp.ge.s32.totalorder %s1860_s14, 1 }
   0xe   : > { %s2389_s21 = scalar_select %p1939_p8, 1, 0 }
   0xf   : > { %s2390_s22 = scalar_select %p1943_p9, 1, 0 }
  0x10   : > { %p111_p11 = scmp.lt.s32.totalorder %s1860_s14, 3  ;;  %s1862_s24 = smov [#allocation5]  }
  0x11   : > { %s124_s25 = sshll.u32 %s1862_s24, 4  ;;  %p1655_p1 = scmp.lt.s32.totalorder %s1860_s14, 2  ;;  %s125_s25 = int_to_ptr.vmem [resolvable:$true] %s124_s25 }
  0x12   : > { %p1950_p13 = pnand %p1505_p10, %p111_p11  ;;  %s31_s28 = sadd.s32 1, %s1856_s13 }
  0x13   : > { %p1959_p4 = pnand %p1655_p1, %p1929_p5  ;;  %p1970_p6 = scmp.ge.s32.totalorder %s31_s28, 2 }
  0x14   : > { %p1642_p0 = pneg %p1950_p13  ;;  %s135_s30 = sand.u32 1, %s1848_s11  }
  0x15   : > { %s1733_s3 = scalar_lea.vmem %s125_s25, 16  ;;  %s1740_s4 = scalar_lea.vmem %s125_s25, 32 }
  0x16   : > { %p1965_p2 = pnand %p1642_p0, %p1925_p3  ;;  %p1734_p11 = scmp.ne.s32.totalorder %s125_s25, %s1733_s3 }
  0x17   : > { %p1741_p12 = scmp.lt.s32.totalorder %s125_s25, %s125_s25  ;;  %p1742_p9 = scmp.lt.s32.totalorder %s1740_s4, %s1733_s3 }
  0x18   : > { %p1724_p10 = pneg %p1965_p2 }
  0x19   : > { %p1743_p0 = por %p1742_p9, %p1741_p12 }
  0x1a   : > { %p1736_p5 = pnand %p1734_p11, %p1724_p10 }
  0x1c   : > { %p1737_p1 = pneg %p1736_p5 }
  0x1e   : > { %p1744_p8 = pnand %p1743_p0, %p1737_p1 }
  0x20   : > { %1747 = shalt.err (!%p1744_p8)
}
  0x21   : > { %1645 = dma.hbm_to_vmem [thread:$0]  (!%p1965_p2), %s2382_s0, 16, %s125_s25, [#allocation6]  }
  0x22   : > { %s2404_s28 = smov (%p1970_p6, %s31_s28), 0  ;;  %s1631_s7 = smul.u32 192, %s135_s30 }
  0x23   : > { %s56_s8 = ssub.s32 %s1856_s13, %s2404_s28  ;;  %s1632_s15 = smul.u32 3072, %s1856_s13 }
  0x24   : > { %p59_p8 = scmp.eq.s32.totalorder %s56_s8, 0  ;;  %s139_s27 = scalar_lea.vmem [#allocation8], %s1631_s7 }
  0x25   : > { %s148_s24 = scalar_lea.hbm %s2383_s1, %s1632_s15  ;;  %s149_s3 = sshll.u32 %s139_s27, 4  ;;  %s150_s3 = int_to_ptr.vmem [resolvable:$true] %s149_s3 }
  0x26   : > { %s1995_s4 = scalar_select %p59_p8, %s1848_s11, %s61_s17  }
  0x27   : > { %s136_s5 = scalar_lea.sflag [#allocation9], %s135_s30  ;;  %p1750_p9 = pneg %p1959_p4 }
  0x28   : > { %s1761_s25 = scalar_lea.vmem %s150_s3, 3072  ;;  %s1863_s29 = smov [#allocation8]  }
  0x29   : > { %p1762_p12 = scmp.ne.s32.totalorder %s150_s3, %s1761_s25  ;;  %s1766_s6 = sshll.u32 %s1863_s29, 4  ;;  %s1767_s6 = int_to_ptr.vmem [resolvable:$false] %s1766_s6 }
  0x2a   : > { %s1768_s8 = scalar_lea.vmem %s1767_s6, 6144  ;;  %p1769_p10 = scmp.lt.s32.totalorder %s150_s3, %s1767_s6 }
  0x2b   : > { %p1764_p2 = pnand %p1762_p12, %p1750_p9  ;;  %p1770_p11 = scmp.lt.s32.totalorder %s1768_s8, %s1761_s25 }
  0x2d   : > { %p1765_p6 = pneg %p1764_p2  ;;  %p1771_p5 = por %p1770_p11, %p1769_p10 }
  0x2f   : > { %p1772_p1 = pnand %p1771_p5, %p1765_p6 }
  0x31   : > { %1775 = shalt.err (!%p1772_p1)
}
  0x32   : > { %s1864_s7 = smov 128   ;;  %s1865_s17 = smov 8  }
  0x33   : > { %1649 = dma.hbm_to_vmem [thread:$0]  (!%p1959_p4), %s148_s24, 3072, %s150_s3, %s136_s5, %s1864_s7, %s1864_s7, %s1865_s17  }
  0x34   : > { %161 = sbr.rel (%p1950_p13) target bundleno = 853 (0x355), region = 28 }
  0x39   : > { %1827 = dma.done.wait (%p1925_p3), [#allocation6], 16  }
  0x3a   : > { %1829 = vsyncadd (%p1925_p3), [#allocation6], 4294967280  ;;  %s2008_s30 = sand.u32 1, %s1844_s10  }
  0x3b   : > { %s1633_s15 = smul.u32 192, %s2008_s30  ;;  %s168_s16 = scalar_lea.sflag [#allocation9], %s2008_s30 }
  0x3d   : > { %s2012_s19 = scalar_lea.vmem [#allocation8], %s1633_s15 }
  0x3e   : > { %1831 = dma.done.wait (%p1935_p7), %s168_s16, 3072  }
  0x3f   : > { %1833 = vsyncadd (%p1935_p7), %s168_s16, 4294964224  ;;  %v2019_v0 = vld [vmem:[%s2012_s19 + $0x18] sm:$0xff]  ;;  %v2024_v2 = vld [vmem:[%s2012_s19] sm:$0xff]  ;;  %vm198_vm0 = vcmask 7168   ;;  %v1866_v49 = vmov -inf   ;;  %v313_v60 = vlaneseq  ;;  %vm351_vm1 = vcmask 130112  }
  0x40   : > { %v2021_v1 = vld [vmem:[#allocation5] ss:$0 sm:$0xff]  ;;  %v2031_v5 = vld [vmem:[%s2012_s19 + $0x20] sm:$0xff]  ;;  %v2034_v6 = vld [vmem:[%s2012_s19 + $0x8] sm:$0xff]  ;;  %199 = vst.msk [vmem:[#allocation2] sm:$0xff] %vm198_vm0, %v1866_v49  ;;  %vm358_vm2 = vcmask 195712  }
  0x41   : > { %v243_v3 = vmul.f32 %v2021_v1, %v2019_v0  ;;  %v240_v4 = vmul.f32 %v2021_v1, %v2024_v2  ;;  %v244_v7 = vmul.f32 %v2021_v1, %v2031_v5  ;;  %v241_v8 = vmul.f32 %v2021_v1, %v2034_v6  ;;  %v2041_v9 = vld [vmem:[%s2012_s19 + $0x28] sm:$0xff]  ;;  %v2044_v10 = vld [vmem:[%s2012_s19 + $0x10] sm:$0xff]  ;;  %v2051_v13 = vld [vmem:[%s2012_s19 + $0x38] sm:$0xff]  ;;  %s1513_s18 = sshll.u32 %s2008_s30, 3  ;;  %s1524_s20 = sshll.u32 %s1852_s12, 7 }
  0x42   : > { %v245_v11 = vmul.f32 %v2021_v1, %v2041_v9  ;;  %v242_v12 = vmul.f32 %v2021_v1, %v2044_v10  ;;  %v2054_v14 = vld [vmem:[%s2012_s19 + $0x30] sm:$0xff]  ;;  %v247_v15 = vmul.f32 %v2021_v1, %v2051_v13  ;;  %v2061_v17 = vld [vmem:[%s2012_s19 + $0x48] sm:$0xff]  ;;  %v2064_v18 = vld [vmem:[%s2012_s19 + $0x40] sm:$0xff]  ;;  %v2141_v63 = vand.u32 127, %v313_v60  ;;  %s191_s23 = scalar_lea.vmem [#allocation10], %s1513_s18  ;;  %s1408_s3 = scalar_lea.hbm %s2384_s2, %s1524_s20 }
  0x43   : > { %270 = vadd.xlane.f32.xlu1 %v243_v3  ;;  %264 = vadd.xlane.f32.xlu0 %v240_v4  ;;  %v246_v16 = vmul.f32 %v2021_v1, %v2054_v14  ;;  %v249_v19 = vmul.f32 %v2021_v1, %v2061_v17  ;;  %v248_v20 = vmul.f32 %v2021_v1, %v2064_v18  ;;  %v2071_v21 = vld [vmem:[%s2012_s19 + $0x58] sm:$0xff]  ;;  %v2074_v22 = vld [vmem:[%s2012_s19 + $0x50] sm:$0xff]  ;;  %v2081_v25 = vld [vmem:[%s2012_s19 + $0x68] sm:$0xff]  ;;  %vm458_vm3 = vcmask 1041409   ;;  %s1410_s26 = sshll.u32 %s191_s23, 4  ;;  %s1397_s5 = scalar_lea.sflag [#allocation7], %s2008_s30  ;;  %s1411_s26 = int_to_ptr.vmem [resolvable:$true] %s1410_s26 }
  0x44   : > { %v251_v23 = vmul.f32 %v2021_v1, %v2071_v21  ;;  %v250_v24 = vmul.f32 %v2021_v1, %v2074_v22  ;;  %v2084_v26 = vld [vmem:[%s2012_s19 + $0x60] sm:$0xff]  ;;  %v253_v27 = vmul.f32 %v2021_v1, %v2081_v25  ;;  %v2091_v29 = vld [vmem:[%s2012_s19 + $0x78] sm:$0xff]  ;;  %v2094_v30 = vld [vmem:[%s2012_s19 + $0x70] sm:$0xff]  ;;  %v346_v4 = vadd.s32 4294967288, %v2141_v63  ;;  %s1776_s25 = scalar_lea.vmem %s1411_s26, 128  ;;  %p2395_p7 = scmp.ne.s32.totalorder %s2389_s21, 0 }
  0x45   : > { %v252_v28 = vmul.f32 %v2021_v1, %v2084_v26  ;;  %v255_v31 = vmul.f32 %v2021_v1, %v2091_v29  ;;  %v254_v32 = vmul.f32 %v2021_v1, %v2094_v30  ;;  %v2101_v33 = vld [vmem:[%s2012_s19 + $0x88] sm:$0xff]  ;;  %v2104_v34 = vld [vmem:[%s2012_s19 + $0x80] sm:$0xff]  ;;  %v2111_v37 = vld [vmem:[%s2012_s19 + $0x98] sm:$0xff]  ;;  %vm460_vm4 = vcmask 1042434   ;;  %p1777_p3 = scmp.ne.s32.totalorder %s1411_s26, %s1776_s25  ;;  %s1871_s29 = smov [#allocation10]  }
  0x46   : > { %v257_v35 = vmul.f32 %v2021_v1, %v2101_v33  ;;  %v256_v36 = vmul.f32 %v2021_v1, %v2104_v34  ;;  %v2114_v38 = vld [vmem:[%s2012_s19 + $0x90] sm:$0xff]  ;;  %v259_v39 = vmul.f32 %v2021_v1, %v2111_v37  ;;  %v2121_v41 = vld [vmem:[%s2012_s19 + $0xa0] sm:$0xff]  ;;  %v2124_v42 = vld [vmem:[%s2012_s19 + $0xa8] sm:$0xff]  ;;  %vm462_vm5 = vcmask 1043459   ;;  %s1780_s6 = sshll.u32 %s1871_s29, 4  ;;  %s1781_s6 = int_to_ptr.vmem [resolvable:$false] %s1780_s6 }
  0x47   : > { %272 = vadd.xlane.f32.xlu1 %v244_v7  ;;  %266 = vadd.xlane.f32.xlu0 %v241_v8  ;;  %v258_v40 = vmul.f32 %v2021_v1, %v2114_v38  ;;  %v260_v43 = vmul.f32 %v2021_v1, %v2121_v41  ;;  %v261_v44 = vmul.f32 %v2021_v1, %v2124_v42  ;;  %v2131_v45 = vld [vmem:[%s2012_s19 + $0xb0] sm:$0xff]  ;;  %v2134_v46 = vld [vmem:[%s2012_s19 + $0xb8] sm:$0xff]  ;;  %v2144_v7 = vshrl.u32 %v313_v60, 7  ;;  %p1778_p13 = pnand %p1777_p3, %p2395_p7  ;;  %s1782_s12 = scalar_lea.vmem %s1781_s6, 256 }
  0x48   : > { %v262_v47 = vmul.f32 %v2021_v1, %v2131_v45  ;;  %v263_v48 = vmul.f32 %v2021_v1, %v2134_v46  ;;  %v353_v8 = vadd.s32 4294967280, %v2141_v63  ;;  %vm464_vm6 = vcmask 1044484   ;;  %p1783_p0 = scmp.lt.s32.totalorder %s1411_s26, %s1781_s6  ;;  %p1784_p8 = scmp.lt.s32.totalorder %s1782_s12, %s1776_s25 }
  0x49   : > { %vm466_vm7 = vcmask 1045509   ;;  %vm468_vm8 = vcmask 1046534   ;;  %vm470_vm9 = vcmask 1047559   ;;  %vm317_vm10 = vcmp.lt.s32.totalorder %v2141_v63, 20  ;;  %p1779_p4 = pneg %p1778_p13 }
  0x4a   : > { %vm475_vm11 = vcmask 195584   ;;  %vm1870_vm12 = vmmov 0   ;;  %p1785_p9 = por %p1784_p8, %p1783_p0 }
  0x4b   : > { %274 = vadd.xlane.f32.xlu1 %v245_v11  ;;  %268 = vadd.xlane.f32.xlu0 %v242_v12 }
  0x4c   : > { %p1786_p12 = pnand %p1785_p9, %p1779_p4 }
  0x4f   : > { %278 = vadd.xlane.f32.xlu1 %v247_v15  ;;  %276 = vadd.xlane.f32.xlu0 %v246_v16  ;;  %v2148_v15 = vsub.s32 %v346_v4, %v2144_v7  ;;  %v2152_v16 = vsub.s32 %v2141_v63, %v2144_v7 }
  0x53   : > { %282 = vadd.xlane.f32.xlu1 %v249_v19  ;;  %280 = vadd.xlane.f32.xlu0 %v248_v20  ;;  %v2155_v19 = vsub.s32 %v353_v8, %v2144_v7 }
  0x57   : > { %286 = vadd.xlane.f32.xlu1 %v251_v23  ;;  %284 = vadd.xlane.f32.xlu0 %v250_v24 }
  0x5b   : > { %290 = vadd.xlane.f32.xlu1 %v253_v27  ;;  %288 = vadd.xlane.f32.xlu0 %v252_v28 }
  0x5f   : > { %294 = vadd.xlane.f32.xlu1 %v255_v31  ;;  %292 = vadd.xlane.f32.xlu0 %v254_v32 }
  0x63   : > { %298 = vadd.xlane.f32.xlu1 %v257_v35  ;;  %296 = vadd.xlane.f32.xlu0 %v256_v36 }
  0x67   : > { %302 = vadd.xlane.f32.xlu1 %v259_v39  ;;  %300 = vadd.xlane.f32.xlu0 %v258_v40 }
  0x6b   : > { %304 = vadd.xlane.f32.xlu0 %v260_v43  ;;  %306 = vadd.xlane.f32.xlu1 %v261_v44 }
  0x6f   : > { %308 = vadd.xlane.f32.xlu0 %v262_v47  ;;  %310 = vadd.xlane.f32.xlu1 %v263_v48 }
  0xcc   : > { %v271_v50 = vpop.xlane.xlu1 %270  ;;  %v265_v51 = vpop.xlane.xlu0 %264 }
  0xcd   : > { %v363_v28 = vrot.slane %v271_v50, %v2152_v16  ;;  %v345_v35 = vrot.slane %v265_v51, %v2152_v16 }
  0xd0   : > { %v273_v52 = vpop.xlane.xlu1 %272  ;;  %v267_v53 = vpop.xlane.xlu0 %266 }
  0xd1   : > { %v367_v24 = vrot.slane %v273_v52, %v2148_v15  ;;  %v350_v27 = vrot.slane %v267_v53, %v2148_v15 }
  0xd3   : > { %v368_v49 = vsel %vm351_vm1, %v367_v24, %v363_v28  ;;  %v352_v50 = vsel %vm351_vm1, %v350_v27, %v345_v35 }
  0xd4   : > { %v275_v54 = vpop.xlane.xlu1 %274  ;;  %v269_v55 = vpop.xlane.xlu0 %268 }
  0xd5   : > { %v372_v31 = vrot.slane %v275_v54, %v2155_v19  ;;  %v357_v36 = vrot.slane %v269_v55, %v2155_v19 }
  0xd7   : > { %v373_v53 = vsel %vm358_vm2, %v372_v31, %v368_v49 }
  0xd8   : > { %v279_v56 = vpop.xlane.xlu1 %278  ;;  %v277_v57 = vpop.xlane.xlu0 %276 }
  0xd9   : > { %v381_v39 = vrot.slane %v279_v56, %v2148_v15  ;;  %v377_v40 = vrot.slane %v277_v57, %v2152_v16  ;;  %v359_v57 = vsel %vm358_vm2, %v357_v36, %v352_v50 }
  0xdc   : > { %v283_v58 = vpop.xlane.xlu1 %282  ;;  %v281_v59 = vpop.xlane.xlu0 %280 }
  0xdd   : > { %v391_v43 = vrot.slane %v283_v58, %v2152_v16  ;;  %v386_v44 = vrot.slane %v281_v59, %v2155_v19  ;;  %v382_v58 = vsel %vm351_vm1, %v381_v39, %v377_v40 }
  0xe0   : > { %v287_v61 = vpop.xlane.xlu1 %286  ;;  %v285_v62 = vpop.xlane.xlu0 %284 }
  0xe1   : > { %v395_v32 = vrot.slane %v285_v62, %v2148_v15  ;;  %v400_v51 = vrot.slane %v287_v61, %v2155_v19  ;;  %v387_v61 = vsel %vm358_vm2, %v386_v44, %v382_v58 }
  0xe3   : > { %v396_v54 = vsel %vm351_vm1, %v395_v32, %v391_v43 }
  0xe4   : > { %v291_v1 = vpop.xlane.xlu1 %290  ;;  %v289_v3 = vpop.xlane.xlu0 %288 }
  0xe5   : > { %v409_v55 = vrot.slane %v291_v1, %v2148_v15  ;;  %v405_v56 = vrot.slane %v289_v3, %v2152_v16  ;;  %v401_v3 = vsel %vm358_vm2, %v400_v51, %v396_v54 }
  0xe8   : > { %v295_v11 = vpop.xlane.xlu1 %294  ;;  %v293_v12 = vpop.xlane.xlu0 %292 }
  0xe9   : > { %v419_v59 = vrot.slane %v295_v11, %v2152_v16  ;;  %v414_v60 = vrot.slane %v293_v12, %v2155_v19  ;;  %v459_v11 = vsel %vm458_vm3, %v373_v53, %v359_v57  ;;  %v410_v12 = vsel %vm351_vm1, %v409_v55, %v405_v56 }
  0xea   : > { %v461_v28 = vsel %vm460_vm4, %v387_v61, %v459_v11 }
  0xeb   : > { %v463_v31 = vsel %vm462_vm5, %v401_v3, %v461_v28 }
  0xec   : > { %v299_v20 = vpop.xlane.xlu1 %298  ;;  %v297_v23 = vpop.xlane.xlu0 %296 }
  0xed   : > { %v423_v52 = vrot.slane %v297_v23, %v2148_v15  ;;  %v428_v62 = vrot.slane %v299_v20, %v2155_v19  ;;  %v415_v20 = vsel %vm358_vm2, %v414_v60, %v410_v12 }
  0xef   : > { %v424_v24 = vsel %vm351_vm1, %v423_v52, %v419_v59 }
  0xf0   : > { %v303_v47 = vpop.xlane.xlu1 %302  ;;  %v301_v48 = vpop.xlane.xlu0 %300  ;;  %v429_v32 = vsel %vm358_vm2, %v428_v62, %v424_v24 }
  0xf1   : > { %v437_v4 = vrot.slane %v303_v47, %v2148_v15  ;;  %v433_v8 = vrot.slane %v301_v48, %v2152_v16  ;;  %v465_v48 = vsel %vm464_vm6, %v415_v20, %v463_v31 }
  0xf2   : > { %v467_v50 = vsel %vm466_vm7, %v429_v32, %v465_v48 }
  0xf3   : > { %v438_v35 = vsel %vm351_vm1, %v437_v4, %v433_v8 }
  0xf4   : > { %v305_v23 = vpop.xlane.xlu0 %304  ;;  %v307_v1 = vpop.xlane.xlu1 %306 }
  0xf5   : > { %v442_v27 = vrot.slane %v305_v23, %v2155_v19  ;;  %v447_v43 = vrot.slane %v307_v1, %v2152_v16 }
  0xf7   : > { %v443_v40 = vsel %vm358_vm2, %v442_v27, %v438_v35 }
  0xf8   : > { %v309_v36 = vpop.xlane.xlu0 %308  ;;  %v311_v39 = vpop.xlane.xlu1 %310  ;;  %v469_v52 = vsel %vm468_vm8, %v443_v40, %v467_v50 }
  0xf9   : > { %v451_v44 = vrot.slane %v309_v36, %v2148_v15  ;;  %v456_v47 = vrot.slane %v311_v39, %v2155_v19  ;;  %v1867_v15 = vmov 0   ;;  %v1868_v19 = vmov 0.0  }
  0xfa   : > { %1714 = vset.pattern.permute.xlu1 %v1867_v15  ;;  %1715 = vset.pattern.permute.xlu0 %v1867_v15  ;;  %200 = vst.msk [vmem:[#allocation3] sm:$0xff] %vm198_vm0, %v1868_v19  ;;  %201 = vst [vmem:[#allocation4] sm:$0x1] %v1868_v19 }
  0xfb   : > { %v452_v49 = vsel %vm351_vm1, %v451_v44, %v447_v43  ;;  %1559 = vmatprep.subr.mxu0 %v1868_v19  ;;  %202 = vst [vmem:[#allocation4 + $0x1] sm:$0x1] %v1868_v19  ;;  %203 = vst [vmem:[#allocation4 + $0x2] sm:$0x1] %v1868_v19  ;;  %1568 = vmatprep.subr.mxu1 %v1868_v19 }
  0xfc   : > { %v457_v51 = vsel %vm358_vm2, %v456_v47, %v452_v49  ;;  %204 = vst [vmem:[#allocation4 + $0x3] sm:$0x1] %v1868_v19  ;;  %205 = vst [vmem:[#allocation4 + $0x4] sm:$0x1] %v1868_v19  ;;  %1560 = vmatpush3.msra.mxu0 %v2044_v10  ;;  %1569 = vmatpush3.msra.mxu1 %v2041_v9  ;;  %v474_v9 = vld [vmem:[#allocation2] sm:$0xff] }
  0xfd   : > { %v471_v53 = vsel %vm470_vm9, %v457_v51, %v469_v52  ;;  %206 = vst [vmem:[#allocation4 + $0x5] sm:$0x1] %v1868_v19  ;;  %207 = vst [vmem:[#allocation4 + $0x6] sm:$0x1] %v1868_v19  ;;  %1561 = vmatprep.subr.mxu0 %v1868_v19  ;;  %1570 = vmatprep.subr.mxu1 %v1868_v19 }
  0xfe   : > { %v2200_v54 = vsel %vm317_vm10, %v471_v53, -inf  ;;  %208 = vst [vmem:[#allocation4 + $0x7] sm:$0x1] %v1868_v19  ;;  %1562 = vmatpush3.msra.mxu0 %v2034_v6  ;;  %1571 = vmatpush3.msra.mxu1 %v2031_v5  ;;  %v1869_v6 = vmov 1966171168  }
  0xff   : > { %v476_v16 = vsel %vm475_vm11, %v2200_v54, -inf  ;;  %1563 = vmatprep.subr.mxu0 %v1868_v19  ;;  %1572 = vmatprep.subr.mxu1 %v1868_v19  ;;  %v502_v56 = vunpack.c.l.s4 %v1869_v6 }
 0x100   : > { %477 = vmax.xlane.f32.xlu0 %v476_v16  ;;  %1564 = vmatpush3.msra.mxu0 %v2024_v2 }
 0x101   : > { %1573 = vmatpush3.msra.mxu1 %v2019_v0  ;;  %1577 = vmatprep.subr.mxu0 %v1868_v19  ;;  %v503_v57 = vunpack.c.0.s8 %v502_v56  ;;  %v549_v48 = vld [vmem:[#allocation4] sm:$0x1] }
 0x102   : > { %1586 = vmatprep.subr.mxu1 %v1868_v19  ;;  %1565 = vmatprep.mubr.msk.f32.mxu0 %vm1870_vm12, %v1868_v19  ;;  %v550_v51 = vld [vmem:[#allocation4 + $0x1] sm:$0x1] }
 0x103   : > { %v2230_v2 = vsub.s32 %v503_v57, %v2144_v7  ;;  %1574 = vmatprep.mubr.msk.f32.mxu1 %vm1870_vm12, %v1868_v19  ;;  %v552_v57 = vld [vmem:[#allocation4 + $0x3] sm:$0x1] }
 0x189   : > { %v478_v10 = vpop.xlane.xlu0 %477 }
 0x18a   : > { %v479_v63 = vmax.f32 %v474_v9, %v478_v10  ;;  %v551_v10 = vld [vmem:[#allocation4 + $0x2] sm:$0x1] }
 0x18c   : > { %v480_v55 = vsub.f32 %v474_v9, %v479_v63  ;;  %1271 = vst.msk [vmem:[#allocation2] sm:$0xff] %vm198_vm0, %v479_v63  ;;  %485 = vperm.xlu1 %1714, %v479_v63  }
 0x18e   : > { %v481_v5 = vmul.f32 1.442695, %v480_v55 }
 0x190   : > { %1716 = vpow2.f32 %v481_v5 }
 0x19d   : > { %v2236_v0 = vpop.eup %1716 }
 0x19e   : > { %v507_v58 = vrot.slane %v2236_v0, %v2230_v2  ;;  %v500_v4 = vcombine.high %v2236_v0, %v2236_v0 }
 0x1a0   : > { %v515_v59 = vcombine.high %v507_v58, %v507_v58  ;;  %v2242_v61 = vrot.slane %v507_v58, %v2230_v2  ;;  %v514_v23 = vrot.slane %v500_v4, %v2230_v2 }
 0x1a2   : > { %v537_v60 = vrot.slane %v515_v59, %v2230_v2  ;;  %v545_v62 = vcombine.high %v2242_v61, %v2242_v61  ;;  %v530_v1 = vrot.slane %v514_v23, %v2230_v2  ;;  %v516_v3 = vcombine.high %v514_v23, %v514_v23  ;;  %v553_v23 = vld [vmem:[#allocation4 + $0x4] sm:$0x1] }
 0x1a4   : > { %566 = vperm.xlu1 %1714, %v537_v60   ;;  %v547_v8 = vcombine.high %v537_v60, %v537_v60  ;;  %v544_v24 = vrot.slane %v516_v3, %v2230_v2  ;;  %v546_v27 = vcombine.high %v530_v1, %v530_v1 }
 0x1a6   : > { %v548_v11 = vcombine.high %v544_v24, %v544_v24 }
 0x1a8   : > { %574 = vperm.xlu1 %1714, %v545_v62  }
 0x1ac   : > { %582 = vperm.xlu1 %1714, %v547_v8  }
 0x1b0   : > { %590 = vperm.xlu1 %1714, %v530_v1  }
 0x1b4   : > { %598 = vperm.xlu1 %1714, %v544_v24  }
 0x1b8   : > { %606 = vperm.xlu1 %1714, %v546_v27   ;;  %v554_v27 = vld [vmem:[#allocation4 + $0x5] sm:$0x1] }
 0x1bc   : > { %614 = vperm.xlu1 %1714, %v548_v11  }
 0x207   : > { %v486_v12 = vpop.permute.xlu1 %485 }
 0x208   : > { %v488_v28 = vsub.f32 %v2200_v54, %v486_v12 }
 0x20a   : > { %v489_v20 = vmul.f32 1.442695, %v488_v28 }
 0x20c   : > { %1718 = vpow2.f32 %v489_v20 }
 0x219   : > { %v1719_v31 = vpop.eup %1718 }
 0x21a   : > { %v493_v32 = vsel %vm475_vm11, %v1719_v31, 0.0  ;;  %v637_v35 = vrot.slane %v1719_v31, %v2230_v2  ;;  %v630_v43 = vcombine.high %v1719_v31, %v1719_v31 }
 0x21b   : > { %494 = vadd.xlane.f32.xlu0 %v493_v32 }
 0x21c   : > { %v653_v36 = vrot.slane %v637_v35, %v2230_v2  ;;  %v645_v39 = vcombine.high %v637_v35, %v637_v35 }
 0x21e   : > { %1566 = vmatmul.mubr.msk.f32.vlgmr.msra.gmra.mxu0 %vm475_vm11, %v653_v36  ;;  %v667_v40 = vrot.slane %v645_v39, %v2230_v2  ;;  %v675_v44 = vcombine.high %v653_v36, %v653_v36  ;;  %v555_v39 = vld [vmem:[#allocation4 + $0x6] sm:$0x1] }
 0x21f   : > { %1578 = vmatpush3.msra.mxu0 %v2064_v18  ;;  %1583 = vmatprep.mubr.msk.f32.mxu0 %vm1870_vm12, %v1868_v19 }
 0x220   : > { %1579 = vmatprep.subr.mxu0 %v1868_v19  ;;  %1575 = vmatmul.mubr.msk.f32.vlgmr.msra.gmra.mxu1 %vm475_vm11, %v667_v40  ;;  %v677_v18 = vcombine.high %v667_v40, %v667_v40 }
 0x221   : > { %1580 = vmatpush3.msra.mxu0 %v2051_v13  ;;  %1587 = vmatpush3.msra.mxu1 %v2071_v21  ;;  %v644_v13 = vrot.slane %v630_v43, %v2230_v2 }
 0x222   : > { %1581 = vmatprep.subr.mxu0 %v1868_v19  ;;  %1588 = vmatprep.subr.mxu1 %v1868_v19 }
 0x223   : > { %1582 = vmatpush3.msra.mxu0 %v2054_v14  ;;  %1589 = vmatpush3.msra.mxu1 %v2074_v22  ;;  %v646_v14 = vcombine.high %v644_v13, %v644_v13 }
 0x224   : > { %1584 = vmatmul.mubr.msk.f32.vlgmr.msra.gmra.mxu0 %vm475_vm11, %v675_v44  ;;  %1590 = vmatprep.subr.mxu1 %v1868_v19  ;;  %v556_v44 = vld [vmem:[#allocation4 + $0x7] sm:$0x1] }
 0x225   : > { %1595 = vmatprep.subr.mxu0 %v1868_v19  ;;  %1591 = vmatpush3.msra.mxu1 %v2061_v17  ;;  %v660_v17 = vrot.slane %v644_v13, %v2230_v2  ;;  %v674_v21 = vrot.slane %v646_v14, %v2230_v2 }
 0x226   : > { %1592 = vmatprep.mubr.msk.f32.mxu1 %vm1870_vm12, %v1868_v19  ;;  %1596 = vmatpush3.msra.mxu0 %v2094_v30 }
 0x227   : > { %1593 = vmatmul.mubr.msk.f32.vlgmr.msra.gmra.mxu1 %vm475_vm11, %v677_v18  ;;  %1597 = vmatprep.subr.mxu0 %v1868_v19  ;;  %v676_v22 = vcombine.high %v660_v17, %v660_v17 }
 0x228   : > { %1604 = vmatprep.subr.mxu1 %v1868_v19  ;;  %1598 = vmatpush3.msra.mxu0 %v2081_v25  ;;  %v678_v25 = vcombine.high %v674_v21, %v674_v21 }
 0x229   : > { %1605 = vmatpush3.msra.mxu1 %v2101_v33  ;;  %1599 = vmatprep.subr.mxu0 %v1868_v19 }
 0x22a   : > { %1606 = vmatprep.subr.mxu1 %v1868_v19  ;;  %1600 = vmatpush3.msra.mxu0 %v2084_v26  ;;  %v491_v26 = vld [vmem:[#allocation3] sm:$0xff] }
 0x22b   : > { %1601 = vmatprep.mubr.msk.f32.mxu0 %vm1870_vm12, %v1868_v19  ;;  %1607 = vmatpush3.msra.mxu1 %v2104_v34 }
 0x22c   : > { %1602 = vmatmul.mubr.msk.f32.vlgmr.msra.gmra.mxu0 %vm475_vm11, %v660_v17  ;;  %1608 = vmatprep.subr.mxu1 %v1868_v19 }
 0x22d   : > { %1613 = vmatprep.subr.mxu0 %v1868_v19  ;;  %1609 = vmatpush3.msra.mxu1 %v2091_v29  ;;  %v492_v29 = vmul.f32 %v2236_v0, %v491_v26 }
 0x22e   : > { %1610 = vmatprep.mubr.msk.f32.mxu1 %vm1870_vm12, %v1868_v19  ;;  %1614 = vmatpush3.msra.mxu0 %v2121_v41 }
 0x22f   : > { %1611 = vmatmul.mubr.msk.f32.vlgmr.msra.gmra.mxu1 %vm475_vm11, %v674_v21  ;;  %1615 = vmatprep.subr.mxu0 %v1868_v19 }
 0x230   : > { %1622 = vmatprep.subr.mxu1 %v1868_v19  ;;  %1616 = vmatpush3.msra.mxu0 %v2111_v37 }
 0x231   : > { %1623 = vmatpush3.msra.mxu1 %v2134_v46  ;;  %1617 = vmatprep.subr.mxu0 %v1868_v19  ;;  %v2317_v46 = vsub.s32 0, %v2144_v7 }
 0x232   : > { %1624 = vmatprep.subr.mxu1 %v1868_v19  ;;  %1618 = vmatpush3.msra.mxu0 %v2114_v38  ;;  %v567_v38 = vpop.permute.xlu1 %566 }
 0x233   : > { %1619 = vmatprep.mubr.msk.f32.mxu0 %vm1870_vm12, %v1868_v19  ;;  %1625 = vmatpush3.msra.mxu1 %v2131_v45  ;;  %v572_v49 = vrot.slane %v567_v38, %v2317_v46  ;;  %v1315_v38 = vsub.s32 6, %v2144_v7 }
 0x234   : > { %1620 = vmatmul.mubr.msk.f32.vlgmr.msra.gmra.mxu0 %vm475_vm11, %v676_v22  ;;  %1626 = vmatprep.subr.mxu1 %v1868_v19 }
 0x235   : > { %1627 = vmatpush3.msra.mxu1 %v2124_v42  ;;  %1628 = vmatprep.mubr.msk.f32.mxu1 %vm1870_vm12, %v1868_v19  ;;  %v622_v15 = vmul.f32 %v572_v49, %v550_v51 }
 0x236   : > { %1629 = vmatmul.mubr.msk.f32.vlgmr.msra.gmra.mxu1 %vm475_vm11, %v678_v25  ;;  %558 = vperm.xlu0 %1715, %v2242_v61   ;;  %v575_v41 = vpop.permute.xlu1 %574 }
 0x237   : > { %v580_v54 = vrot.slane %v575_v41, %v2317_v46  ;;  %v1319_v41 = vsub.s32 7, %v2144_v7 }
 0x239   : > { %v623_v56 = vmul.f32 %v580_v54, %v551_v10 }
 0x23a   : > { %v583_v42 = vpop.permute.xlu1 %582 }
 0x23b   : > { %v588_v55 = vrot.slane %v583_v42, %v2317_v46 }
 0x23d   : > { %v624_v60 = vmul.f32 %v588_v55, %v552_v57 }
 0x23e   : > { %v591_v50 = vpop.permute.xlu1 %590 }
 0x23f   : > { %v596_v61 = vrot.slane %v591_v50, %v2317_v46 }
 0x241   : > { %v625_v24 = vmul.f32 %v596_v61, %v553_v23 }
 0x242   : > { %v599_v5 = vpop.permute.xlu1 %598 }
 0x243   : > { %v604_v3 = vrot.slane %v599_v5, %v2317_v46 }
 0x245   : > { %v626_v31 = vmul.f32 %v604_v3, %v554_v27 }
 0x246   : > { %v607_v4 = vpop.permute.xlu1 %606 }
 0x247   : > { %v612_v32 = vrot.slane %v607_v4, %v2317_v46 }
 0x249   : > { %v627_v18 = vmul.f32 %v612_v32, %v555_v39 }
 0x24a   : > { %v615_v28 = vpop.permute.xlu1 %614 }
 0x24b   : > { %v620_v40 = vrot.slane %v615_v28, %v2317_v46 }
 0x24d   : > { %v628_v17 = vmul.f32 %v620_v40, %v556_v44 }
 0x2a4   : > { %v495_v30 = vpop.xlane.xlu0 %494 }
 0x2a5   : > { %v496_v33 = vadd.f32 %v495_v30, %v492_v29  ;;  %v1295_v29 = vsub.s32 1, %v2144_v7  ;;  %v1299_v30 = vsub.s32 2, %v2144_v7 }
 0x2a7   : > { %498 = vst.msk [vmem:[#allocation3] sm:$0xff] %vm198_vm0, %v496_v33  ;;  %v1303_v33 = vsub.s32 3, %v2144_v7 }
 0x2ae   : > { %v1275_v34 = vld [vmem:[#allocation3] sm:$0xff] }
 0x2af   : > { %1720 = vrcp.f32 %v1275_v34  ;;  %v1307_v34 = vsub.s32 4, %v2144_v7 }
 0x2b1   : > { %v559_v45 = vpop.permute.xlu0 %558 }
 0x2b2   : > { %v564_v47 = vrot.slane %v559_v45, %v2317_v46 }
 0x2b4   : > { %v621_v52 = vmul.f32 %v564_v47, %v549_v48 }
 0x2bc   : > { %v1721_v37 = vpop.eup %1720 }
 0x2bd   : > { %1287 = vperm.xlu1 %1714, %v1721_v37   ;;  %v1311_v37 = vsub.s32 5, %v2144_v7 }
 0x2de   : > { %v747_v53 = vpop.f32.mrf.mxu0 }
 0x2df   : > { %v1255_v16 = vadd.f32 %v747_v53, %v621_v52 }
 0x2e0   : > { %v1567_v19 = vpop.f32.mrf.mxu0  ;;  %v819_v9 = vpop.f32.mrf.mxu1 }
 0x2e1   : > { %1263 = vst [vmem:[#allocation4] sm:$0x1] %v1255_v16  ;;  %v1256_v63 = vadd.f32 %v819_v9, %v622_v15 }
 0x2e2   : > { %v1576_v6 = vpop.f32.mrf.mxu1 }
 0x2e3   : > { %1264 = vst [vmem:[#allocation4 + $0x1] sm:$0x1] %v1256_v63 }
 0x2e4   : > { %v891_v0 = vpop.f32.mrf.mxu0 }
 0x2e5   : > { %v1257_v58 = vadd.f32 %v891_v0, %v623_v56 }
 0x2e6   : > { %v1585_v59 = vpop.f32.mrf.mxu0 }
 0x2e7   : > { %1265 = vst [vmem:[#allocation4 + $0x2] sm:$0x1] %v1257_v58  ;;  %v963_v62 = vpop.f32.mrf.mxu1 }
 0x2e8   : > { %v1258_v8 = vadd.f32 %v963_v62, %v624_v60  ;;  %v1277_v45 = vld [vmem:[#allocation4] sm:$0x1] }
 0x2e9   : > { %v1594_v1 = vpop.f32.mrf.mxu1 }
 0x2ea   : > { %1266 = vst [vmem:[#allocation4 + $0x3] sm:$0x1] %v1258_v8  ;;  %v1278_v47 = vld [vmem:[#allocation4 + $0x1] sm:$0x1] }
 0x2ec   : > { %v1035_v11 = vpop.f32.mrf.mxu0 }
 0x2ed   : > { %v1259_v12 = vadd.f32 %v1035_v11, %v625_v24 }
 0x2ee   : > { %v1603_v20 = vpop.f32.mrf.mxu0  ;;  %v1279_v52 = vld [vmem:[#allocation4 + $0x2] sm:$0x1] }
 0x2ef   : > { %1267 = vst [vmem:[#allocation4 + $0x4] sm:$0x1] %v1259_v12  ;;  %v1107_v35 = vpop.f32.mrf.mxu1 }
 0x2f0   : > { %v1260_v36 = vadd.f32 %v1107_v35, %v626_v31 }
 0x2f1   : > { %v1612_v43 = vpop.f32.mrf.mxu1  ;;  %v1280_v53 = vld [vmem:[#allocation4 + $0x3] sm:$0x1] }
 0x2f2   : > { %1268 = vst [vmem:[#allocation4 + $0x5] sm:$0x1] %v1260_v36 }
 0x2f4   : > { %v1179_v13 = vpop.f32.mrf.mxu0 }
 0x2f5   : > { %v1261_v14 = vadd.f32 %v1179_v13, %v627_v18 }
 0x2f6   : > { %v1621_v21 = vpop.f32.mrf.mxu0  ;;  %v1251_v22 = vpop.f32.mrf.mxu1  ;;  %v1281_v54 = vld [vmem:[#allocation4 + $0x4] sm:$0x1] }
 0x2f7   : > { %1269 = vst [vmem:[#allocation4 + $0x6] sm:$0x1] %v1261_v14  ;;  %v1262_v25 = vadd.f32 %v1251_v22, %v628_v17 }
 0x2f8   : > { %v1630_v26 = vpop.f32.mrf.mxu1 }
 0x2f9   : > { %1270 = vst [vmem:[#allocation4 + $0x7] sm:$0x1] %v1262_v25  ;;  %v1282_v10 = vld [vmem:[#allocation4 + $0x5] sm:$0x1] }
 0x2fe   : > { %v1283_v63 = vld [vmem:[#allocation4 + $0x6] sm:$0x1] }
 0x300   : > { %v1284_v55 = vld [vmem:[#allocation4 + $0x7] sm:$0x1] }
 0x338   : > { %v1288_v42 = vpop.permute.xlu1 %1287 }
 0x339   : > { %v1292_v48 = vrot.slane %v1288_v42, %v2317_v46  ;;  %v1296_v49 = vrot.slane %v1288_v42, %v1295_v29  ;;  %v1300_v50 = vrot.slane %v1288_v42, %v1299_v30  ;;  %v1304_v51 = vrot.slane %v1288_v42, %v1303_v33 }
 0x33a   : > { %v1308_v16 = vrot.slane %v1288_v42, %v1307_v34  ;;  %v1312_v15 = vrot.slane %v1288_v42, %v1311_v37  ;;  %v1316_v19 = vrot.slane %v1288_v42, %v1315_v38  ;;  %v1320_v9 = vrot.slane %v1288_v42, %v1319_v41 }
 0x33b   : > { %v1329_v7 = vmul.f32 %v1292_v48, %v1277_v45  ;;  %v1330_v5 = vmul.f32 %v1296_v49, %v1278_v47  ;;  %v1331_v6 = vmul.f32 %v1300_v50, %v1279_v52  ;;  %v1332_v56 = vmul.f32 %v1304_v51, %v1280_v53 }
 0x33c   : > { %v1333_v57 = vmul.f32 %v1308_v16, %v1281_v54  ;;  %v1334_v46 = vmul.f32 %v1312_v15, %v1282_v10  ;;  %v1335_v0 = vmul.f32 %v1316_v19, %v1283_v63  ;;  %v1336_v58 = vmul.f32 %v1320_v9, %v1284_v55 }
 0x33d   : > { %v1345_v59 = vcombine.low %v1329_v7, %v1330_v5  ;;  %v1346_v60 = vcombine.low %v1331_v6, %v1332_v56 }
 0x33e   : > { %v1347_v61 = vcombine.low %v1333_v57, %v1334_v46  ;;  %v1348_v62 = vcombine.low %v1335_v0, %v1336_v58 }
 0x33f   : > { %v1355_v4 = vrot.slane %v1345_v59, %v2230_v2  ;;  %v1362_v8 = vrot.slane %v1346_v60, %v2230_v2 }
 0x340   : > { %v1369_v23 = vrot.slane %v1347_v61, %v2230_v2  ;;  %v1376_v1 = vrot.slane %v1348_v62, %v2230_v2 }
 0x341   : > { %v1377_v3 = vcombine.low %v1355_v4, %v1362_v8 }
 0x342   : > { %v1378_v24 = vcombine.low %v1369_v23, %v1376_v1 }
 0x343   : > { %v1385_v27 = vrot.slane %v1377_v3, %v2230_v2 }
 0x344   : > { %v1392_v11 = vrot.slane %v1378_v24, %v2230_v2 }
 0x346   : > { %v1393_v12 = vcombine.low %v1385_v27, %v1392_v11 }
 0x348   : > { %1395 = vst [vmem:[%s191_s23] sm:$0xff] %v1393_v12 }
 0x349   : > { %1789 = shalt.err (!%p1786_p12)
}
 0x34a   : > { %s1790_s8 = scalar_lea.hbm %s1408_s3, 128  ;;  %s1794_s30 = scalar_lea.hbm %s2384_s2, 256 }
 0x34b   : > { %p1791_p2 = scmp.ne.s32.totalorder %s1408_s3, %s1790_s8  ;;  %p1795_p11 = scmp.lt.s32.totalorder %s1408_s3, %s2384_s2 }
 0x34c   : > { %p1796_p5 = scmp.lt.s32.totalorder %s1794_s30, %s1790_s8 }
 0x34d   : > { %p1792_p6 = pnand %p1791_p2, %p2395_p7 }
 0x34e   : > { %p1797_p1 = por %p1796_p5, %p1795_p11 }
 0x34f   : > { %p1793_p10 = pneg %p1792_p6 }
 0x351   : > { %p1798_p3 = pnand %p1797_p1, %p1793_p10 }
 0x353   : > { %1801 = shalt.err (!%p1798_p3)
}
 0x354   : > { %1640 = dma.vmem_to_hbm [thread:$0]  (%p2395_p7), %s1411_s26, 128, %s1408_s3, %s1397_s5  }
 0x355 PF: > { %s1422_s19 = sand.u32 1, %s1840_s9   ;;  %p2396_p13 = scmp.ne.s32.totalorder %s2390_s22, 0 }
 0x356   : > { %p2397_p4 = scmp.ge.s32.totalorder %s1860_s14, 2  ;;  %s1423_s18 = scalar_lea.sflag [#allocation7], %s1422_s19 }
 0x358   : > { %p1651_p0 = pnand %p2397_p4, %p2396_p13 }
 0x35a   : > { %p1652_p8 = pneg %p1651_p0 }
 0x35c   : > { %1835 = dma.done.wait (%p1652_p8), %s1423_s18, 128  }
 0x35d   : > { %1837 = vsyncadd (%p1652_p8), %s1423_s18, 4294967168  ;;  %s19_s14 = sadd.s32 1, %s1860_s14   ;;  %s2398_s9 = smov %s1844_s10 }
 0x35e   : > { %p16_p9 = scmp.ge.s32.totalorder %s19_s14, 4   ;;  %s2399_s10 = smov %s1848_s11 }
 0x35f   : > { %s2400_s11 = smov %s1995_s4  ;;  %s2401_s12 = smov %s1856_s13 }
 0x360   : > { %s2402_s13 = smov %s2404_s28  ;;  %18 = sbr.rel (!%p16_p9) target bundleno = 7 (0x7), region = 86 }
 0x365   :  { %1428 = vsyncpa [#allocation6], 1 }
 0x366   :  { %1430 = vsyncpa [#allocation6 + $0x1], 1 }
 0x367   :  { %1431 = vsyncpa [#allocation9], 1 }
 0x368   :  { %1433 = vsyncpa [#allocation9 + $0x1], 1 }
 0x369   :  { %1434 = vsyncpa [#allocation7], 1 }
 0x36a   :  { %1436 = vsyncpa [#allocation7 + $0x1], 1 }

</bundles_post_ra>
